<compile_context>
chip_gen: v5e
topology: v5e:2x2
jax: 0.10.0
libtpu: 0.0.40
codegen_flags: <defaults>
</compile_context>

<pallas_src>
import functools

import jax
import jax.numpy as jnp
from jax import lax
from jax.experimental import pallas as pl
from jax.experimental.pallas import tpu as pltpu


_LANE = 128
_TD_MAX = 512 * 1024            # upper cap on lane-tile width (multiple of 128)
_VMEM_SLACK = 4 * 1024 * 1024   # headroom for scratch / semaphores / internals


def _sublane_pad(rows, itemsize):
    """Rows after TPU sublane padding ((8,128) f32 tiles, (16,128) bf16, ...)."""
    mult = 8 * max(1, 4 // max(1, itemsize))
    return ((rows + mult - 1) // mult) * mult


@functools.lru_cache(maxsize=None)
def _vmem_limit_bytes():
    """Per-generation scoped-VMEM limit (~5/8 of physical, capped at 96 MiB)."""
    try:
        phys = int(pltpu.get_tpu_info().vmem_capacity_bytes)
    except Exception:
        phys = 64 * 1024 * 1024          # conservative fallback (v7x per-TC VMEM)
    return int(min(phys * 5 // 8, 96 * 1024 * 1024))


def _pick_tile(G, D, itemsize, vmem_limit, cap=None):
    """Largest 128-multiple lane tile whose double-buffered blocks fit VMEM."""
    cap = _TD_MAX if cap is None else cap
    if D < _LANE:
        return D                          # tiny tensor: one full-width block
    # Padding-aware per-lane cost: (G,tD) input + (1,tD) mean output, x2 buffers.
    per_lane = 2 * (_sublane_pad(G, itemsize) + _sublane_pad(1, itemsize)) * itemsize
    budget = max(_LANE * per_lane, vmem_limit - _VMEM_SLACK)
    by_vmem = max(_LANE, (budget // per_lane) // _LANE * _LANE)
    return int(max(_LANE, min(cap, by_vmem, (D // _LANE) * _LANE)))


@functools.lru_cache(maxsize=None)
def _stride0_bcast_supported():
    """Probe once: does this build lower (and correctly run) stride-0 broadcast loads?"""
    def k(x_ref, o_ref):
        o_ref[...] = x_ref[pl.ds(0, 4, stride=0), :]
    try:
        x = jnp.arange(4 * _LANE, dtype=jnp.float32).reshape(4, _LANE)
        out = pl.pallas_call(
            k, out_shape=jax.ShapeDtypeStruct((4, _LANE), jnp.float32))(x)
        return bool(jnp.array_equal(out, jnp.broadcast_to(x[0:1], (4, _LANE))))
    except Exception:
        return False


# ------------------------- fused kernel: Gram partials + group mean -------------------------
def _fused_kernel(g_ref, gram_ref, mean_ref, gram_acc, *,
                  tiles_per_core, tD, D, group, inv_g, may_be_partial,
                  use_bcast_load):
    c = pl.program_id(0)        # TensorCore / D-half split ("parallel")
    j = pl.program_id(1)        # lane-tile index within this half ("arbitrary")

    @pl.when(j == 0)
    def _():
        gram_acc[...] = jnp.zeros_like(gram_acc)

    g32 = g_ref[...].astype(jnp.float32)                        # (G, tD)

    # Group-mean contribution: per-column sums, f32 accumulation.  No mask:
    # OOB output columns of a ragged tile are clipped on writeback, and the
    # overhang step of an odd split re-writes the last real block idempotently.
    mean_ref[...] = (jnp.sum(g32, axis=0, keepdims=True) * inv_g).astype(mean_ref.dtype)

    def row_bcast(r):
        # Row r broadcast over the G sublanes (vld slot, no XLU) when available.
        if use_bcast_load:
            return g_ref[pl.ds(r, group, stride=0), :].astype(jnp.float32)
        return g32[r:r + 1, :]                                   # implicit broadcast

    col = lax.broadcasted_iota(jnp.int32, (group, group), 1)

    def gram_tile(keep):
        # Gram update on VPU: 16 pair products via G sublane-broadcast multiplies
        # + G lane reductions (avoids the tiny-output MXU matmul lowering).
        upd = jnp.zeros((group, group), jnp.float32)
        for r in range(group):
            prod = g32 * row_bcast(r)                            # (G, tD)
            if keep is not None:
                prod = jnp.where(keep, prod, 0.0)                # ragged/overhang only
            s_r = jnp.sum(prod, axis=-1, keepdims=True)          # (G, 1) = gram[:, r]
            upd = upd + jnp.where(col == r, s_r, 0.0)
        return upd

    gidx = c * tiles_per_core + j        # un-clamped global tile index
    start = gidx * tD

    if may_be_partial:
        is_partial = (start + tD) > D
        @pl.when(jnp.logical_not(is_partial))
        def _():
            gram_acc[...] += gram_tile(None)
        @pl.when(is_partial)
        def _():
            lane = lax.broadcasted_iota(jnp.int32, (group, tD), 1)
            gram_acc[...] += gram_tile((start + lane) < D)
    else:
        gram_acc[...] += gram_tile(None)

    @pl.when(j == pl.num_programs(1) - 1)
    def _():
        gram_ref[0] = gram_acc[...]


def _mean_kernel(g_ref, mean_ref, *, inv_g):
    # Gram-free variant for the statically bypassed ('attention_layer2.bias') path.
    g32 = g_ref[...].astype(jnp.float32)
    mean_ref[...] = (jnp.sum(g32, axis=0, keepdims=True) * inv_g).astype(mean_ref.dtype)


@functools.partial(jax.jit,
                   static_argnames=("force_pass", "tD", "vmem_limit", "use_bcast_load"))
def _fused_impl(grad, *, force_pass, tD, vmem_limit, use_bcast_load):
    G, D = grad.shape
    n_tiles = pl.cdiv(D, tD)
    # Unconditional 2-way split so v7x's two TensorCores each own ~half of D.
    nc = 2 if n_tiles >= 2 else 1
    tiles_per_core = pl.cdiv(n_tiles, nc)
    has_overhang = nc * tiles_per_core > n_tiles
    may_be_partial = (D % tD != 0) or has_overhang

    def tile_idx(c, j):
        # Clamp so the overhang step of an odd split re-reads/re-writes the
        # last real block (idempotent) instead of going out of bounds.
        return (0, jnp.minimum(c * tiles_per_core + j, n_tiles - 1))

    in_spec = pl.BlockSpec((G, tD), tile_idx)
    mean_spec = pl.BlockSpec((1, tD), tile_idx)
    cparams = pltpu.CompilerParams(
        dimension_semantics=("parallel", "arbitrary"),
        vmem_limit_bytes=vmem_limit)

    if force_pass:
        # torch forces sim = ones for this tensor -> always the mean; skip Gram.
        mean = pl.pallas_call(
            functools.partial(_mean_kernel, inv_g=1.0 / G),
            out_shape=jax.ShapeDtypeStruct((1, D), grad.dtype),
            grid_spec=pltpu.PrefetchScalarGridSpec(
                num_scalar_prefetch=0,
                grid=(nc, tiles_per_core),
                in_specs=[in_spec],
                out_specs=mean_spec),
            compiler_params=cparams,
        )(grad)
        return mean[0]

    kernel = functools.partial(
        _fused_kernel, tiles_per_core=tiles_per_core, tD=tD, D=D, group=G,
        inv_g=1.0 / G, may_be_partial=may_be_partial,
        use_bcast_load=use_bcast_load)

    gram_parts, mean = pl.pallas_call(
        kernel,
        out_shape=(jax.ShapeDtypeStruct((nc, G, G), jnp.float32),
                   jax.ShapeDtypeStruct((1, D), grad.dtype)),
        grid_spec=pltpu.PrefetchScalarGridSpec(
            num_scalar_prefetch=0,
            grid=(nc, tiles_per_core),
            in_specs=[in_spec],
            out_specs=(pl.BlockSpec((1, G, G), lambda c, j: (c, 0, 0)),
                       mean_spec),
            scratch_shapes=[pltpu.VMEM((G, G), jnp.float32)]),
        compiler_params=cparams,
    )(grad)

    mean1d = mean[0]                                             # (D,)

    # Tiny (G, G) cosine epilogue in plain JAX (fused into the same jit).
    # Intentionally NO eps on the norms: the torch module's cos_similar divides
    # by the raw norms, so a zero row yields 0/0 = NaN -> gate fires -> zeros.
    gram = jnp.sum(gram_parts, axis=0)                           # combine core partials
    norm = jnp.sqrt(jnp.diagonal(gram))                          # row norms from diag
    sim = gram / norm[:, None] / norm[None, :]
    upper = jnp.triu(jnp.ones((G, G), dtype=bool))               # i <= j as scanned in torch
    bad = jnp.any(upper & ((sim < 0.0) | jnp.isnan(sim)))
    return jnp.where(bad, jnp.zeros_like(mean1d), mean1d)


def _fused_forward(grad, force_pass, tile_cap=None):
    """Wrapper: hardware queries / tile sizing outside jit, then the jitted impl."""
    G, D = grad.shape
    vmem_limit = _vmem_limit_bytes()
    tD = _pick_tile(G, D, grad.dtype.itemsize, vmem_limit, tile_cap)
    return _fused_impl(grad, force_pass=bool(force_pass), tD=tD,
                       vmem_limit=vmem_limit,
                       use_bcast_load=_stride0_bcast_supported())


class GradientAttentionMean:
    """JAX/Pallas port of gradient_attention_mean.forward."""

    def __init__(self, group_num):
        self.group_num = group_num

    def __call__(self, gradient_dict, gradient_1d_size_dict):
        out = {}
        for name, grad in gradient_dict.items():
            G, D = grad.shape
            assert G == self.group_num
            assert D == gradient_1d_size_dict[name]
            # TODO(synk): batch all tensors of the dict into a single pallas_call
            # (concat along D + scalar-prefetched per-tile segment/tensor ids,
            # resetting the Gram accumulator at segment boundaries) to amortize
            # per-call dispatch overhead when the dict has many small params.
            out[name] = _fused_forward(
                grad, force_pass=(name == 'attention_layer2.bias'))
        return out


# ------------------------- pure-JAX reference (sanity check) -------------------------
def _ref_forward(group_num, gradient_dict, gradient_1d_size_dict):
    out = {}
    for name, g in gradient_dict.items():
        gram = g @ g.T
        n = jnp.linalg.norm(g, axis=-1)
        sim = gram / n[:, None] / n[None, :]
        if name == 'attention_layer2.bias':
            sim = jnp.ones_like(sim)
        upper = jnp.triu(jnp.ones((group_num, group_num), dtype=bool))
        bad = jnp.any(upper & ((sim < 0) | jnp.isnan(sim)))
        out[name] = jnp.where(bad,
                              jnp.zeros((gradient_1d_size_dict[name],), g.dtype),
                              jnp.mean(g, axis=0))
    return out


if __name__ == "__main__":
    key = jax.random.PRNGKey(0)
    group_num = 4
    k1, k2, k3, k4, k5, k6, k7, k8 = jax.random.split(key, 8)

    # 1) Strongly correlated rows -> all cosine sims clearly positive -> mean path.
    base = jax.random.normal(k1, (1, 256), jnp.float32)
    g_enc = base + 0.05 * jax.random.normal(k2, (group_num, 256), jnp.float32)
    # 2) The special-cased bias name -> forced all-ones similarity -> mean path.
    g_bias = jax.random.normal(k3, (group_num, 128), jnp.float32)
    # 3) Row 1 is the negation of row 0 -> sim[0,1] = -1 -> zeros path.
    g_dec = jax.random.normal(k4, (group_num, 384), jnp.float32)
    g_dec = g_dec.at[1].set(-g_dec[0])

    gradient_dict = {
        'encoder.weight': g_enc,
        'attention_layer2.bias': g_bias,
        'decoder.weight': g_dec,
    }
    gradient_1d_size_dict = {n: int(v.shape[1]) for n, v in gradient_dict.items()}

    module = GradientAttentionMean(group_num)
    out = jax.block_until_ready(module(gradient_dict, gradient_1d_size_dict))

    ref = _ref_forward(group_num, gradient_dict, gradient_1d_size_dict)
    for name in gradient_dict:
        assert out[name].shape == (gradient_1d_size_dict[name],)
        assert jnp.allclose(out[name], ref[name], atol=1e-5, rtol=1e-5), name

    # Extra coverage (small shapes, forced small tiles):
    # a) multi-tile, even 2-way split (D=512, tD=128 -> 4 tiles, nc=2), mean path.
    base2 = jax.random.normal(k5, (1, 512), jnp.float32)
    g_multi = base2 + 0.05 * jax.random.normal(k6, (group_num, 512), jnp.float32)
    r_multi = jax.block_until_ready(
        _fused_forward(g_multi, force_pass=False, tile_cap=128))
    ref_multi = _ref_forward(group_num, {'w': g_multi}, {'w': 512})['w']
    assert jnp.allclose(r_multi, ref_multi, atol=1e-5, rtol=1e-5)

    # b) ragged last tile + odd tile count overhang (D=300, tD=128 -> 3 tiles), mean path.
    g_rag = base2[:, :300] + 0.05 * jax.random.normal(k6, (group_num, 300), jnp.float32)
    r_rag = jax.block_until_ready(
        _fused_forward(g_rag, force_pass=False, tile_cap=128))
    ref_rag = _ref_forward(group_num, {'w': g_rag}, {'w': 300})['w']
    assert jnp.allclose(r_rag, ref_rag, atol=1e-5, rtol=1e-5)

    # c) ragged last tile, zeros path (anti-correlated pair).
    g_ragz = jax.random.normal(k4, (group_num, 300), jnp.float32)
    g_ragz = g_ragz.at[1].set(-g_ragz[0])
    r_ragz = jax.block_until_ready(
        _fused_forward(g_ragz, force_pass=False, tile_cap=128))
    assert jnp.allclose(r_ragz, jnp.zeros((300,), jnp.float32))

    # d) odd tile count, no raggedness (D=384, tD=128 -> 3 tiles, masked overhang), mean path.
    base3 = jax.random.normal(k7, (1, 384), jnp.float32)
    g_over = base3 + 0.05 * jax.random.normal(k8, (group_num, 384), jnp.float32)
    r_over = jax.block_until_ready(
        _fused_forward(g_over, force_pass=False, tile_cap=128))
    ref_over = _ref_forward(group_num, {'w': g_over}, {'w': 384})['w']
    assert jnp.allclose(r_over, ref_over, atol=1e-5, rtol=1e-5)

    # e) zero row -> 0/0 = NaN similarity -> zeros path (matches torch's eps-free cos_similar).
    g_zero = jax.random.normal(k8, (group_num, 256), jnp.float32)
    g_zero = g_zero.at[0].set(0.0)
    r_zero = jax.block_until_ready(_fused_forward(g_zero, force_pass=False))
    assert jnp.allclose(r_zero, jnp.zeros((256,), jnp.float32))

    print("KERNEL_OK")
</pallas_src>

<mosaic_0001>
module attributes {stable_mosaic.version = 11 : i64} {
  func.func @k(%arg0: memref<4x128xf32, #tpu.memory_space<vmem>>, %arg1: memref<4x128xf32, #tpu.memory_space<vmem>>) attributes {dimension_semantics = [], scalar_prefetch = 0 : i64, scratch_operands = 0 : i64, tpu.core_type = #tpu.core_type<tc>} {
    %c0 = arith.constant 0 : index
    %c0_0 = arith.constant 0 : index
    %0 = tpu.strided_load %arg0[%c0, %c0_0] {strides = array<i32: 0, 1>} : memref<4x128xf32, #tpu.memory_space<vmem>>, vector<4x128xf32>
    %c0_1 = arith.constant 0 : index
    %c0_2 = arith.constant 0 : index
    %1 = vector.load %arg1[%c0_1, %c0_2] : memref<4x128xf32, #tpu.memory_space<vmem>>, vector<4x128xf32>
    tpu.vector_store %arg1[%c0_1, %c0_2], %0 {strides = array<i32>} : memref<4x128xf32, #tpu.memory_space<vmem>>, vector<4x128xf32>,
    return
  }
}

module attributes {stable_mosaic.version = 11 : i64} {
  func.func @_fused_kernel(%arg0: i32, %arg1: i32, %arg2: memref<4x256xf32, #tpu.memory_space<vmem>>, %arg3: memref<1x4x4xf32, #tpu.memory_space<vmem>>, %arg4: memref<1x256xf32, #tpu.memory_space<vmem>>, %arg5: memref<4x4xf32, #tpu.memory_space<vmem>>) attributes {dimension_semantics = [#tpu.dimension_semantics<parallel>, #tpu.dimension_semantics<arbitrary>], iteration_bounds = array<i64: 1, 1>, scalar_prefetch = 0 : i64, scratch_operands = 1 : i64, tpu.core_type = #tpu.core_type<tc>, window_params = [{transform_indices = @transform_0, window_bounds = array<i64: 4, 256>}, {transform_indices = @transform_1, window_bounds = array<i64: 1, 4, 4>}, {transform_indices = @transform_2, window_bounds = array<i64: 1, 256>}]} {
    %c0_i32 = arith.constant 0 : i32
    %0 = arith.cmpi eq, %arg1, %c0_i32 : i32
    %1 = arith.extui %0 : i1 to i32
    %c0_i32_0 = arith.constant 0 : i32
    %2 = arith.cmpi ne, %1, %c0_i32_0 : i32
    scf.if %2 {
      %cst_21 = arith.constant 0.000000e+00 : f32
      %65 = vector.broadcast %cst_21 : f32 to vector<4x4xf32>
      %c0_22 = arith.constant 0 : index
      %c0_23 = arith.constant 0 : index
      %66 = vector.load %arg5[%c0_22, %c0_23] : memref<4x4xf32, #tpu.memory_space<vmem>>, vector<4x4xf32>
      tpu.vector_store %arg5[%c0_22, %c0_23], %65 {strides = array<i32>} : memref<4x4xf32, #tpu.memory_space<vmem>>, vector<4x4xf32>,
    } else {
    }
    %c0 = arith.constant 0 : index
    %c0_1 = arith.constant 0 : index
    %3 = vector.load %arg2[%c0, %c0_1] : memref<4x256xf32, #tpu.memory_space<vmem>>, vector<4x256xf32>
    %cst = arith.constant dense<0.000000e+00> : vector<256xf32>
    %4 = vector.multi_reduction <add>, %3, %cst [0] : vector<4x256xf32> to vector<256xf32>
    %5 = vector.shape_cast %4 : vector<256xf32> to vector<1x256xf32>
    %cst_2 = arith.constant 2.500000e-01 : f32
    %6 = vector.broadcast %cst_2 : f32 to vector<1x256xf32>
    %7 = arith.mulf %5, %6 : vector<1x256xf32>
    %c0_3 = arith.constant 0 : index
    %c0_4 = arith.constant 0 : index
    %8 = vector.load %arg4[%c0_3, %c0_4] : memref<1x256xf32, #tpu.memory_space<vmem>>, vector<1x256xf32>
    tpu.vector_store %arg4[%c0_3, %c0_4], %7 {strides = array<i32>} : memref<1x256xf32, #tpu.memory_space<vmem>>, vector<1x256xf32>,
    %9 = tpu.iota {dimensions = array<i32: 1>} : vector<4x4xi32>
    %c0_5 = arith.constant 0 : index
    %c0_6 = arith.constant 0 : index
    %10 = vector.load %arg5[%c0_5, %c0_6] : memref<4x4xf32, #tpu.memory_space<vmem>>, vector<4x4xf32>
    %cst_7 = arith.constant 0.000000e+00 : f32
    %11 = vector.broadcast %cst_7 : f32 to vector<4x4xf32>
    %12 = vector.extract_strided_slice %3 {offsets = [0, 0], sizes = [1, 256], strides = [1, 1]} : vector<4x256xf32> to vector<1x256xf32>
    %13 = vector.broadcast %12 : vector<1x256xf32> to vector<4x256xf32>
    %14 = arith.mulf %3, %13 : vector<4x256xf32>
    %cst_8 = arith.constant dense<0.000000e+00> : vector<4xf32>
    %15 = vector.multi_reduction <add>, %14, %cst_8 [1] : vector<4x256xf32> to vector<4xf32>
    %16 = vector.shape_cast %15 : vector<4xf32> to vector<4x1xf32>
    %c0_i32_9 = arith.constant 0 : i32
    %17 = vector.broadcast %c0_i32_9 : i32 to vector<4x4xi32>
    %18 = arith.cmpi eq, %9, %17 : vector<4x4xi32>
    %cst_10 = arith.constant 0.000000e+00 : f32
    %19 = vector.shape_cast %16 : vector<4x1xf32> to vector<4x1xf32>
    %20 = vector.broadcast %19 : vector<4x1xf32> to vector<4x4xf32>
    %21 = vector.broadcast %cst_10 : f32 to vector<4x4xf32>
    %22 = arith.select %18, %20, %21 : vector<4x4xi1>, vector<4x4xf32>
    %23 = arith.addf %11, %22 : vector<4x4xf32>
    %24 = vector.extract_strided_slice %3 {offsets = [1, 0], sizes = [1, 256], strides = [1, 1]} : vector<4x256xf32> to vector<1x256xf32>
    %25 = vector.broadcast %24 : vector<1x256xf32> to vector<4x256xf32>
    %26 = arith.mulf %3, %25 : vector<4x256xf32>
    %cst_11 = arith.constant dense<0.000000e+00> : vector<4xf32>
    %27 = vector.multi_reduction <add>, %26, %cst_11 [1] : vector<4x256xf32> to vector<4xf32>
    %28 = vector.shape_cast %27 : vector<4xf32> to vector<4x1xf32>
    %c1_i32 = arith.constant 1 : i32
    %29 = vector.broadcast %c1_i32 : i32 to vector<4x4xi32>
    %30 = arith.cmpi eq, %9, %29 : vector<4x4xi32>
    %cst_12 = arith.constant 0.000000e+00 : f32
    %31 = vector.shape_cast %28 : vector<4x1xf32> to vector<4x1xf32>
    %32 = vector.broadcast %31 : vector<4x1xf32> to vector<4x4xf32>
    %33 = vector.broadcast %cst_12 : f32 to vector<4x4xf32>
    %34 = arith.select %30, %32, %33 : vector<4x4xi1>, vector<4x4xf32>
    %35 = arith.addf %23, %34 : vector<4x4xf32>
    %36 = vector.extract_strided_slice %3 {offsets = [2, 0], sizes = [1, 256], strides = [1, 1]} : vector<4x256xf32> to vector<1x256xf32>
    %37 = vector.broadcast %36 : vector<1x256xf32> to vector<4x256xf32>
    %38 = arith.mulf %3, %37 : vector<4x256xf32>
    %cst_13 = arith.constant dense<0.000000e+00> : vector<4xf32>
    %39 = vector.multi_reduction <add>, %38, %cst_13 [1] : vector<4x256xf32> to vector<4xf32>
    %40 = vector.shape_cast %39 : vector<4xf32> to vector<4x1xf32>
    %c2_i32 = arith.constant 2 : i32
    %41 = vector.broadcast %c2_i32 : i32 to vector<4x4xi32>
    %42 = arith.cmpi eq, %9, %41 : vector<4x4xi32>
    %cst_14 = arith.constant 0.000000e+00 : f32
    %43 = vector.shape_cast %40 : vector<4x1xf32> to vector<4x1xf32>
    %44 = vector.broadcast %43 : vector<4x1xf32> to vector<4x4xf32>
    %45 = vector.broadcast %cst_14 : f32 to vector<4x4xf32>
    %46 = arith.select %42, %44, %45 : vector<4x4xi1>, vector<4x4xf32>
    %47 = arith.addf %35, %46 : vector<4x4xf32>
    %48 = vector.extract_strided_slice %3 {offsets = [3, 0], sizes = [1, 256], strides = [1, 1]} : vector<4x256xf32> to vector<1x256xf32>
    %49 = vector.broadcast %48 : vector<1x256xf32> to vector<4x256xf32>
    %50 = arith.mulf %3, %49 : vector<4x256xf32>
    %cst_15 = arith.constant dense<0.000000e+00> : vector<4xf32>
    %51 = vector.multi_reduction <add>, %50, %cst_15 [1] : vector<4x256xf32> to vector<4xf32>
    %52 = vector.shape_cast %51 : vector<4xf32> to vector<4x1xf32>
    %c3_i32 = arith.constant 3 : i32
    %53 = vector.broadcast %c3_i32 : i32 to vector<4x4xi32>
    %54 = arith.cmpi eq, %9, %53 : vector<4x4xi32>
    %cst_16 = arith.constant 0.000000e+00 : f32
    %55 = vector.shape_cast %52 : vector<4x1xf32> to vector<4x1xf32>
    %56 = vector.broadcast %55 : vector<4x1xf32> to vector<4x4xf32>
    %57 = vector.broadcast %cst_16 : f32 to vector<4x4xf32>
    %58 = arith.select %54, %56, %57 : vector<4x4xi1>, vector<4x4xf32>
    %59 = arith.addf %47, %58 : vector<4x4xf32>
    %60 = arith.addf %10, %59 : vector<4x4xf32>
    %c0_17 = arith.constant 0 : index
    %c0_18 = arith.constant 0 : index
    %61 = vector.load %arg5[%c0_17, %c0_18] : memref<4x4xf32, #tpu.memory_space<vmem>>, vector<4x4xf32>
    tpu.vector_store %arg5[%c0_17, %c0_18], %60 {strides = array<i32>} : memref<4x4xf32, #tpu.memory_space<vmem>>, vector<4x4xf32>,
    %c0_i32_19 = arith.constant 0 : i32
    %62 = arith.cmpi eq, %arg1, %c0_i32_19 : i32
    %63 = arith.extui %62 : i1 to i32
    %c0_i32_20 = arith.constant 0 : i32
    %64 = arith.cmpi ne, %63, %c0_i32_20 : i32
    scf.if %64 {
      %c0_21 = arith.constant 0 : index
      %c0_22 = arith.constant 0 : index
      %65 = vector.load %arg5[%c0_21, %c0_22] : memref<4x4xf32, #tpu.memory_space<vmem>>, vector<4x4xf32>
      %c0_23 = arith.constant 0 : index
      %c0_24 = arith.constant 0 : index
      %c0_25 = arith.constant 0 : index
      %66 = vector.load %arg3[%c0_23, %c0_24, %c0_25] : memref<1x4x4xf32, #tpu.memory_space<vmem>>, vector<1x4x4xf32>
      %67 = vector.shape_cast %66 : vector<1x4x4xf32> to vector<4x4xf32>
      %68 = vector.shape_cast %65 : vector<4x4xf32> to vector<1x4x4xf32>
      tpu.vector_store %arg3[%c0_23, %c0_24, %c0_25], %68 {strides = array<i32>} : memref<1x4x4xf32, #tpu.memory_space<vmem>>, vector<1x4x4xf32>,
    } else {
    }
    return
  }
  func.func @transform_0(%arg0: i32, %arg1: i32) -> (i32, i32) {
    %c1_i32 = arith.constant 1 : i32
    %0 = arith.muli %arg0, %c1_i32 : i32
    %1 = arith.addi %0, %arg1 : i32
    %c0_i32 = arith.constant 0 : i32
    %2 = arith.minsi %1, %c0_i32 : i32
    %c0_i32_0 = arith.constant 0 : i32
    %c0_i32_1 = arith.constant 0 : i32
    return %c0_i32_0, %2 : i32, i32
  }
  func.func @transform_1(%arg0: i32, %arg1: i32) -> (i32, i32, i32) {
    %c0_i32 = arith.constant 0 : i32
    %c0_i32_0 = arith.constant 0 : i32
    %c0_i32_1 = arith.constant 0 : i32
    return %arg0, %c0_i32, %c0_i32_0 : i32, i32, i32
  }
  func.func @transform_2(%arg0: i32, %arg1: i32) -> (i32, i32) {
    %c1_i32 = arith.constant 1 : i32
    %0 = arith.muli %arg0, %c1_i32 : i32
    %1 = arith.addi %0, %arg1 : i32
    %c0_i32 = arith.constant 0 : i32
    %2 = arith.minsi %1, %c0_i32 : i32
    %c0_i32_0 = arith.constant 0 : i32
    %c0_i32_1 = arith.constant 0 : i32
    return %c0_i32_0, %2 : i32, i32
  }
}

</mosaic_0001>

<bundles_post_ra>
// kernel: tpu_custom_call.1
= control target key start
LH: loop header
LB: loop body
LE: loop exit
PB: predicated region body
PF: predicated region fallthrough
CT: control target
= control target key end

     0   :  { %6 = vsyncpa [#allocation3], 0  ;;  %s114_s0 = inlined_call_operand.hbm [shape: f32[4,128], index: 0, kind: input, shape index: {}]   ;;  %s115_s1 = inlined_call_operand.hbm [shape: f32[4,128], index: 1, kind: output, shape index: {}]  }
   0x1   :  { %7 = vsyncpa [#allocation4], 0  ;;  %s13_s8 = sshll.u32 %s114_s0, 4  ;;  %s96_s9 = smov [#allocation2]   ;;  %s14_s8 = int_to_ptr.hbm [resolvable:$true] %s13_s8 }
   0x2   :  { %s15_s10 = sshll.u32 %s96_s9, 4  ;;  %s16_s10 = int_to_ptr.vmem [resolvable:$true] %s15_s10 }
   0x3   :  { %18 = dma.hbm_to_vmem [thread:$0]  %s14_s8, 64, %s16_s10, [#allocation3]  }
   0x4   :  { %92 = dma.done.wait [#allocation3], 64  }
   0x5   :  { %93 = vsyncadd [#allocation3], 4294967232  ;;  %s97_s11 = smov [#allocation5]   ;;  %s32_s15 = sshll.u32 %s115_s1, 4  ;;  %s33_s15 = int_to_ptr.hbm [resolvable:$true] %s32_s15 }
   0x6   :  { %s30_s12 = sshll.u32 %s97_s11, 4  ;;  %v23_v0 = vld [vmem:[#allocation2] ss:$0 sm:$0xf]  ;;  %s31_s12 = int_to_ptr.vmem [resolvable:$true] %s30_s12 }
   0x7   :  { %24 = vst [vmem:[#allocation5] sm:$0xf] %v23_v0 }
   0x8   :  { %35 = dma.vmem_to_hbm [thread:$0]  %s31_s12, 64, %s33_s15, [#allocation4]  }
   0x9   :  { %94 = dma.done.wait [#allocation4], 64  }
   0xa   :  { %95 = vsyncadd [#allocation4], 4294967232 }
   0xb   :  { %40 = vsyncpa [#allocation3], 1 }
   0xc   :  { %41 = vsyncpa [#allocation4], 1 }

// kernel: _fused_impl.1
= control target key start
LH: loop header
LB: loop body
LE: loop exit
PB: predicated region body
PF: predicated region fallthrough
CT: control target
= control target key end

     0   :  { %8 = vsyncpa [#allocation4], 0  ;;  %s269_s12 = smov [#allocation3]   ;;  %s312_s0 = inlined_call_operand.hbm [shape: f32[4,256], index: 0, kind: input, shape index: {}]   ;;  %s313_s1 = inlined_call_operand.vmem [shape: f32[1,4,4], index: 1, kind: output, shape index: {0}]   ;;  %s314_s2 = inlined_call_operand.vmem [shape: f32[1,256], index: 2, kind: output, shape index: {1}]  }
   0x1   :  { %s20_s11 = sshll.u32 %s312_s0, 4  ;;  %s22_s13 = sshll.u32 %s269_s12, 4  ;;  %s21_s11 = int_to_ptr.hbm [resolvable:$true] %s20_s11  ;;  %s23_s13 = int_to_ptr.vmem [resolvable:$true] %s22_s13 }
   0x2   :  { %25 = dma.hbm_to_vmem [thread:$0]  %s21_s11, 128, %s23_s13, [#allocation4]  }
   0x3   :  { %267 = dma.done.wait [#allocation4], 128  }
   0x4   :  { %268 = vsyncadd [#allocation4], 4294967168  ;;  %v58_v0 = vld [vmem:[#allocation3] sm:$0xff]  ;;  %vm65_vm0 = vcmask 1043456   ;;  %vm85_vm1 = vcmask 1040384   ;;  %vm56_vm3 = vcmask 27648  }
   0x5   :  { %60 = vst [vmem:[#allocation1] ss:$2 sm:$0xff] %v58_v0  ;;  %v96_v1 = vperm.slane %v58_v0, 0  ;;  %v97_v2 = vperm.slane %v58_v0, 4  ;;  %v123_v3 = vperm.slane %v58_v0, 5  ;;  %v122_v6 = vperm.slane %v58_v0, 1 }
   0x6   :  { %v149_v12 = vperm.slane %v58_v0, 6  ;;  %v148_v17 = vperm.slane %v58_v0, 2  ;;  %v175_v22 = vperm.slane %v58_v0, 7  ;;  %v174_v29 = vperm.slane %v58_v0, 3 }
   0x7   :  { %v100_v4 = vperm.slane %v96_v1, 0  ;;  %v101_v5 = vperm.slane %v97_v2, 0  ;;  %v127_v7 = vperm.slane %v123_v3, 1  ;;  %v126_v10 = vperm.slane %v122_v6, 1 }
   0x8   :  { %v153_v18 = vperm.slane %v149_v12, 2  ;;  %v152_v20 = vperm.slane %v148_v17, 2  ;;  %v179_v30 = vperm.slane %v175_v22, 3  ;;  %v178_v32 = vperm.slane %v174_v29, 3 }
   0x9   :  { %v104_v8 = vrot.slane %v101_v5, 4  ;;  %v130_v11 = vrot.slane %v127_v7, 4  ;;  %v88_v2 = vlaneseq  ;;  %v270_v6 = vmov 0.0  }
   0xa   :  { %v156_v21 = vrot.slane %v153_v18, 4  ;;  %v182_v33 = vrot.slane %v179_v30, 4  ;;  %57 = vst.msk [vmem:[#allocation2] sm:$0xf] %vm56_vm3, %v270_v6 }
   0xb   :  { %v105_v9 = vsel %vm65_vm0, %v100_v4, %v104_v8  ;;  %v131_v16 = vsel %vm65_vm0, %v126_v10, %v130_v11  ;;  %vm90_vm2 = vcmp.lt.s32.totalorder %v88_v2, 256  ;;  %v94_v8 = vand.u32 127, %v88_v2 }
   0xc   :  { %v61_v13 = vld.sshfl [vmem:[#allocation1] sm:$0xff pattern:$0x75316420]  ;;  %v62_v14 = vld.sshfl [vmem:[#allocation1 + $0x8] sm:$0xff pattern:$0x75316420]  ;;  %v107_v15 = vmul.f32 %v105_v9, %v58_v0  ;;  %v133_v19 = vmul.f32 %v131_v16, %v58_v0  ;;  %v157_v28 = vsel %vm65_vm0, %v152_v20, %v156_v21  ;;  %v183_v39 = vsel %vm65_vm0, %v178_v32, %v182_v33 }
   0xd   :  { %v159_v31 = vmul.f32 %v157_v28, %v58_v0  ;;  %v185_v40 = vmul.f32 %v183_v39, %v58_v0  ;;  %v73_v51 = vsel %vm65_vm0, %v62_v14, 0.0  ;;  %v66_v57 = vsel %vm65_vm0, %v61_v13, 0.0 }
   0xe   :  { %109 = vst [vmem:[#allocation1] ss:$2 sm:$0xff] %v107_v15  ;;  %v74_v52 = vrot.slane %v73_v51, 4  ;;  %v67_v58 = vrot.slane %v66_v57, 4  ;;  %vm119_vm4 = vcmp.eq.s32.totalorder %v94_v8, 0  ;;  %vm145_vm5 = vcmp.eq.s32.totalorder %v94_v8, 1 }
   0xf   :  { %vm171_vm6 = vcmp.eq.s32.totalorder %v94_v8, 2  ;;  %vm197_vm7 = vcmp.eq.s32.totalorder %v94_v8, 3 }
  0x10   :  { %v75_v53 = vadd.f32 %v74_v52, %v73_v51  ;;  %v68_v60 = vadd.f32 %v67_v58, %v66_v57 }
  0x11   :  { %v95_v17 = vld [vmem:[#allocation2] sm:$0xf] }
  0x12   :  { %v76_v54 = vrot.slane %v75_v53, 2  ;;  %v69_v61 = vrot.slane %v68_v60, 2 }
  0x14   :  { %v77_v55 = vadd.f32 %v76_v54, %v75_v53  ;;  %v70_v63 = vadd.f32 %v69_v61, %v68_v60 }
  0x15   :  { %v110_v23 = vld.sshfl [vmem:[#allocation1] sm:$0xff pattern:$0x75316420]  ;;  %v111_v24 = vld.sshfl [vmem:[#allocation1 + $0x8] sm:$0xff pattern:$0x75316420] }
  0x16   :  { %v114_v25 = vsel %vm65_vm0, %v110_v23, 0.0  ;;  %v115_v26 = vsel %vm65_vm0, %v111_v24, 0.0  ;;  %135 = vst [vmem:[#allocation1] ss:$2 sm:$0xff] %v133_v19  ;;  %v78_v56 = vrot.slane %v77_v55, 1  ;;  %v71_v0 = vrot.slane %v70_v63, 1 }
  0x17   :  { %v116_v27 = vadd.f32 %v115_v26, %v114_v25 }
  0x18   :  { %v79_v59 = vadd.f32 %v78_v56, %v77_v55  ;;  %v72_v3 = vadd.f32 %v71_v0, %v70_v63 }
  0x19   :  { %117 = vadd.xlane.f32.xlu0 %v116_v27 }
  0x1a   :  { %v81_v62 = vmul.f32 0.25, %v79_v59  ;;  %v80_v4 = vmul.f32 0.25, %v72_v3 }
  0x1c   :  { %v84_v1 = vrot.slane %v81_v62, 7 }
  0x1d   :  { %v136_v34 = vld.sshfl [vmem:[#allocation1] sm:$0xff pattern:$0x75316420]  ;;  %v137_v35 = vld.sshfl [vmem:[#allocation1 + $0x8] sm:$0xff pattern:$0x75316420] }
  0x1e   :  { %v140_v36 = vsel %vm65_vm0, %v136_v34, 0.0  ;;  %v141_v37 = vsel %vm65_vm0, %v137_v35, 0.0  ;;  %161 = vst [vmem:[#allocation1] ss:$2 sm:$0xff] %v159_v31  ;;  %v86_v5 = vsel %vm85_vm1, %v80_v4, %v84_v1 }
  0x1f   :  { %v142_v38 = vadd.f32 %v141_v37, %v140_v36  ;;  %92 = vst.msk [vmem:[%s314_s2] sm:$0x3] %vm90_vm2, %v86_v5 }
  0x21   :  { %143 = vadd.xlane.f32.xlu0 %v142_v38 }
  0x25   :  { %v162_v41 = vld.sshfl [vmem:[#allocation1] sm:$0xff pattern:$0x75316420]  ;;  %v163_v42 = vld.sshfl [vmem:[#allocation1 + $0x8] sm:$0xff pattern:$0x75316420] }
  0x26   :  { %v166_v43 = vsel %vm65_vm0, %v162_v41, 0.0  ;;  %v167_v44 = vsel %vm65_vm0, %v163_v42, 0.0  ;;  %187 = vst [vmem:[#allocation1] ss:$2 sm:$0xff] %v185_v40 }
  0x27   :  { %v168_v45 = vadd.f32 %v167_v44, %v166_v43 }
  0x29   :  { %169 = vadd.xlane.f32.xlu1 %v168_v45 }
  0x2d   :  { %v188_v46 = vld.sshfl [vmem:[#allocation1] sm:$0xff pattern:$0x75316420]  ;;  %v189_v47 = vld.sshfl [vmem:[#allocation1 + $0x8] sm:$0xff pattern:$0x75316420] }
  0x2e   :  { %v192_v48 = vsel %vm65_vm0, %v188_v46, 0.0  ;;  %v193_v49 = vsel %vm65_vm0, %v189_v47, 0.0 }
  0x2f   :  { %v194_v50 = vadd.f32 %v193_v49, %v192_v48 }
  0x31   :  { %195 = vadd.xlane.f32.xlu1 %v194_v50 }
  0x8c   :  { %v118_v7 = vpop.xlane.xlu0 %117 }
  0x8d   :  { %v120_v11 = vsel %vm119_vm4, %v118_v7, 0.0 }
  0x94   :  { %v144_v9 = vpop.xlane.xlu0 %143 }
  0x95   :  { %v146_v12 = vsel %vm145_vm5, %v144_v9, 0.0 }
  0x96   :  { %v147_v14 = vadd.f32 %v146_v12, %v120_v11 }
  0x9c   :  { %v170_v10 = vpop.xlane.xlu1 %169 }
  0x9d   :  { %v172_v13 = vsel %vm171_vm6, %v170_v10, 0.0 }
  0x9e   :  { %v173_v15 = vadd.f32 %v172_v13, %v147_v14 }
  0xa4   :  { %v196_v16 = vpop.xlane.xlu1 %195 }
  0xa5   :  { %v198_v18 = vsel %vm197_vm7, %v196_v16, 0.0 }
  0xa6   :  { %v199_v19 = vadd.f32 %v198_v18, %v173_v15 }
  0xa8   :  { %v200_v20 = vadd.f32 %v199_v19, %v95_v17 }
  0xaa   :  { %202 = vst.msk [vmem:[#allocation2] sm:$0xf] %vm56_vm3, %v200_v20 }
  0xb1   :  { %v206_v21 = vld [vmem:[#allocation2] sm:$0xf] }
  0xb2   :  { %207 = vst.msk [vmem:[%s313_s1] sm:$0xf] %vm56_vm3, %v206_v21 }
  0xb3   :  { %234 = vsyncpa [#allocation4], 1 }

</bundles_post_ra>
